<compile_context>
chip_gen: v7x
topology: tpu7x:2x2x1
jax: 0.10.0
libtpu: 0.0.40
codegen_flags: <defaults>
</compile_context>

<pallas_src>
import jax
import jax.numpy as jnp
from jax import lax
from jax.experimental import pallas as pl
from jax.experimental.pallas import tpu as pltpu


N_STATES = 8
N_ACTIONS = 4
H1, H2 = 600, 300          # PyTorch hidden widths
H1P, H2P = 640, 384        # lane-aligned (multiple-of-128) padded widths


def _round_up(x, m):
    return (x + m - 1) // m * m


# ---------------------------------------------------------------------------
# Kernel: one batch tile of the 3-layer critic MLP.
# ---------------------------------------------------------------------------
def critic_kernel(sa_ref, w1_ref, b1_ref, w2_ref, b2_ref, w3_ref, b3_ref,
                  out_ref):
    sa = sa_ref[...].astype(jnp.bfloat16)                    # (TB, 16)

    # fc1: cat([s, a]) (padded) @ W1  — bf16 MXU, f32 accumulate.
    h1 = jnp.dot(sa, w1_ref[...], preferred_element_type=jnp.float32)
    h1 = jnp.maximum(h1 + b1_ref[...], 0.0)                  # (TB, 640), pad cols = 0

    # fc2
    h2 = jnp.dot(h1.astype(jnp.bfloat16), w2_ref[...],
                 preferred_element_type=jnp.float32)
    h2 = jnp.maximum(h2 + b2_ref[...], 0.0)                  # (TB, 384), pad cols = 0

    # q head (300 -> 1): contract the feature axis of h2 against the weight
    # row so the result is produced directly as a lane-dense (1, TB) row.
    q = lax.dot_general(w3_ref[...], h2.astype(jnp.bfloat16),
                        dimension_numbers=(((1,), (1,)), ((), ())),
                        preferred_element_type=jnp.float32)   # (1, TB)
    q = q + b3_ref[...]                                       # (1,1) broadcast
    out_ref[...] = jnp.maximum(q, 0.0).astype(out_ref.dtype)  # module's final ReLU


# ---------------------------------------------------------------------------
# Parameter packing (PyTorch layout -> kernel layout)
# ---------------------------------------------------------------------------
def pack_params(params, n_states, n_actions, weight_dtype=jnp.bfloat16):
    """Zero-pad / cast PyTorch-layout params into the kernel layout."""
    w1, b1, w2, b2, w3, b3 = params        # w*: (in, out), b*: (1, out)
    d_inp = _round_up(n_states + n_actions, 8)

    def pad_to(x, shape):
        return jnp.pad(x, [(0, t - s) for s, t in zip(x.shape, shape)])

    w1p = pad_to(w1, (d_inp, H1P)).astype(weight_dtype)      # (16, 640)
    b1p = pad_to(b1, (1, H1P)).astype(jnp.float32)
    w2p = pad_to(w2, (H1P, H2P)).astype(weight_dtype)        # (640, 384)
    b2p = pad_to(b2, (1, H2P)).astype(jnp.float32)
    w3p = pad_to(w3.T, (1, H2P)).astype(weight_dtype)        # (1, 384) row vector
    b3p = b3.reshape(1, 1).astype(jnp.float32)
    return (w1p, b1p, w2p, b2p, w3p, b3p)


# ---------------------------------------------------------------------------
# Wrapper
# ---------------------------------------------------------------------------
def critic_forward(state, action, packed, *, tb_max=1024):
    """state: (B, n_states), action: (B, n_actions) -> q: (B, 1)."""
    B = state.shape[0]
    w1p, b1p, w2p, b2p, w3p, b3p = packed
    d_inp = w1p.shape[0]

    # Host-side concat of the tiny (B, 12) input: one trivial XLA op that
    # replaces two skinny in-kernel DMA streams and a K=4 MXU pass.
    sa = jnp.concatenate([state, action], axis=1)
    d_in = sa.shape[1]

    # Batch tile: multiple of 8 sublanes, capped at tb_max. Ensure >= 2 grid
    # steps whenever possible so v7x's second TensorCore isn't idle.
    TB = min(tb_max, _round_up(B, 8))
    if B > 8 and _round_up(B, TB) // TB < 2:
        TB = _round_up(pl.cdiv(B, 2), 8)
    B_pad = _round_up(B, TB)
    num_tiles = B_pad // TB

    sa = jnp.pad(sa, ((0, B_pad - B), (0, d_inp - d_in)))

    def resident(arr):
        # Same block index every grid step => stays VMEM-resident, no re-DMA.
        return pl.BlockSpec(arr.shape, lambda i: (0,) * arr.ndim)

    # Resident weights are fetched once per call (not per grid step).
    flops = 2 * B_pad * (d_inp * H1P + H1P * H2P + H2P)
    bytes_accessed = (int(sa.nbytes) + B_pad * 4
                      + sum(int(a.nbytes) for a in packed))

    out = pl.pallas_call(
        critic_kernel,
        out_shape=jax.ShapeDtypeStruct((num_tiles, TB), jnp.float32),
        grid=(num_tiles,),
        in_specs=[pl.BlockSpec((TB, d_inp), lambda i: (i, 0)),
                  resident(w1p), resident(b1p),
                  resident(w2p), resident(b2p),
                  resident(w3p), resident(b3p)],
        out_specs=pl.BlockSpec((1, TB), lambda i: (i, 0)),   # lane-dense rows
        compiler_params=pltpu.CompilerParams(
            dimension_semantics=("parallel",),
            vmem_limit_bytes=32 * 1024 * 1024),
        cost_estimate=pl.CostEstimate(
            flops=flops, transcendentals=0, bytes_accessed=bytes_accessed),
    )(sa, w1p, b1p, w2p, b2p, w3p, b3p)

    # (num_tiles, TB) row-major flatten is exactly batch order.
    return out.reshape(B_pad, 1)[:B]


# ---------------------------------------------------------------------------
# Init + reference
# ---------------------------------------------------------------------------
def init_params(key, n_states, n_actions):
    """PyTorch Linear default init U(-1/sqrt(fan_in), +1/sqrt(fan_in))."""
    d_in = n_states + n_actions
    dims = [(d_in, H1), (H1, H2), (H2, 1)]
    params = []
    for fan_in, fan_out in dims:
        key, kw, kb = jax.random.split(key, 3)
        bound = 1.0 / jnp.sqrt(float(fan_in))
        w = jax.random.uniform(kw, (fan_in, fan_out), jnp.float32,
                               minval=-bound, maxval=bound)
        b = jax.random.uniform(kb, (1, fan_out), jnp.float32,
                               minval=-bound, maxval=bound)
        params.extend([w, b])
    return tuple(params)


def reference_forward(state, action, params, weight_dtype=jnp.float32):
    """Plain-JAX reference (f32 math; weights optionally rounded to bf16)."""
    w1, b1, w2, b2, w3, b3 = params
    cast = lambda w: w.astype(weight_dtype).astype(jnp.float32)
    sa = jnp.concatenate([state, action], axis=1)
    h1 = jnp.maximum(sa @ cast(w1) + b1, 0.0)
    h2 = jnp.maximum(h1 @ cast(w2) + b2, 0.0)
    return jnp.maximum(h2 @ cast(w3) + b3, 0.0)


if __name__ == "__main__":
    n_states, n_actions = N_STATES, N_ACTIONS

    key = jax.random.PRNGKey(0)
    key, kparams = jax.random.split(key)
    params = init_params(kparams, n_states, n_actions)
    packed = pack_params(params, n_states, n_actions)

    for batch in (2, 300):   # single-tile and multi-tile (megacore) paths
        key, ks, ka = jax.random.split(key, 3)
        state = jax.random.normal(ks, (batch, n_states), jnp.float32)
        action = jax.random.normal(ka, (batch, n_actions), jnp.float32)

        q = critic_forward(state, action, packed)
        q = jax.block_until_ready(q)

        # Check against a reference with bf16-rounded weights (isolates the
        # intentional weight quantization from kernel correctness) ...
        q_ref_bf16w = reference_forward(state, action, params,
                                        weight_dtype=jnp.bfloat16)
        # ... and a loose sanity check against the full-f32 module semantics.
        q_ref_f32 = reference_forward(state, action, params)

        assert q.shape == (batch, 1)
        assert jnp.allclose(q, q_ref_bf16w, atol=3e-2, rtol=3e-2)
        assert jnp.allclose(q, q_ref_f32, atol=1e-1, rtol=1e-1)

    print("KERNEL_OK")
</pallas_src>

<mosaic_0001>
module attributes {stable_mosaic.version = 11 : i64} {
  func.func @critic_kernel(%arg0: i32, %arg1: memref<8x16xf32, #tpu.memory_space<vmem>>, %arg2: memref<16x640xbf16, #tpu.memory_space<vmem>>, %arg3: memref<1x640xf32, #tpu.memory_space<vmem>>, %arg4: memref<640x384xbf16, #tpu.memory_space<vmem>>, %arg5: memref<1x384xf32, #tpu.memory_space<vmem>>, %arg6: memref<1x384xbf16, #tpu.memory_space<vmem>>, %arg7: memref<1x1xf32, #tpu.memory_space<vmem>>, %arg8: memref<1x8xf32, #tpu.memory_space<vmem>>) attributes {dimension_semantics = [#tpu.dimension_semantics<parallel>], iteration_bounds = array<i64: 1>, scalar_prefetch = 0 : i64, scratch_operands = 0 : i64, tpu.core_type = #tpu.core_type<tc>, window_params = [{transform_indices = @transform_0, window_bounds = array<i64: 8, 16>}, {pipeline_mode = #tpu.pipeline_mode<synchronous>, transform_indices = @transform_1, window_bounds = array<i64: 16, 640>}, {pipeline_mode = #tpu.pipeline_mode<synchronous>, transform_indices = @transform_2, window_bounds = array<i64: 1, 640>}, {pipeline_mode = #tpu.pipeline_mode<synchronous>, transform_indices = @transform_3, window_bounds = array<i64: 640, 384>}, {pipeline_mode = #tpu.pipeline_mode<synchronous>, transform_indices = @transform_4, window_bounds = array<i64: 1, 384>}, {pipeline_mode = #tpu.pipeline_mode<synchronous>, transform_indices = @transform_5, window_bounds = array<i64: 1, 384>}, {pipeline_mode = #tpu.pipeline_mode<synchronous>, transform_indices = @transform_6, window_bounds = array<i64: 1, 1>}, {transform_indices = @transform_7, window_bounds = array<i64: 1, 8>}]} {
    %c0 = arith.constant 0 : index
    %c0_0 = arith.constant 0 : index
    %0 = vector.load %arg1[%c0, %c0_0] : memref<8x16xf32, #tpu.memory_space<vmem>>, vector<8x16xf32>
    %1 = arith.truncf %0 : vector<8x16xf32> to vector<8x16xbf16>
    %c0_1 = arith.constant 0 : index
    %c0_2 = arith.constant 0 : index
    %2 = vector.load %arg2[%c0_1, %c0_2] : memref<16x640xbf16, #tpu.memory_space<vmem>>, vector<16x640xbf16>
    %cst = arith.constant dense<0.000000e+00> : vector<8x640xf32>
    %3 = tpu.matmul %1, %2, %cst {dimension_numbers = #tpu.dot_dimension_numbers<[1], [0], [0], [1], [0, 0, 1, 1], [], []>} : vector<8x16xbf16>, vector<16x640xbf16>, vector<8x640xf32> -> vector<8x640xf32>
    %c0_3 = arith.constant 0 : index
    %c0_4 = arith.constant 0 : index
    %4 = vector.load %arg3[%c0_3, %c0_4] : memref<1x640xf32, #tpu.memory_space<vmem>>, vector<1x640xf32>
    %5 = vector.broadcast %4 : vector<1x640xf32> to vector<8x640xf32>
    %6 = arith.addf %3, %5 : vector<8x640xf32>
    %cst_5 = arith.constant 0.000000e+00 : f32
    %7 = vector.broadcast %cst_5 : f32 to vector<8x640xf32>
    %8 = arith.maximumf %6, %7 : vector<8x640xf32>
    %9 = arith.truncf %8 : vector<8x640xf32> to vector<8x640xbf16>
    %c0_6 = arith.constant 0 : index
    %c0_7 = arith.constant 0 : index
    %10 = vector.load %arg4[%c0_6, %c0_7] : memref<640x384xbf16, #tpu.memory_space<vmem>>, vector<640x384xbf16>
    %cst_8 = arith.constant dense<0.000000e+00> : vector<8x384xf32>
    %11 = tpu.matmul %9, %10, %cst_8 {dimension_numbers = #tpu.dot_dimension_numbers<[1], [0], [0], [1], [0, 0, 1, 1], [], []>} : vector<8x640xbf16>, vector<640x384xbf16>, vector<8x384xf32> -> vector<8x384xf32>
    %c0_9 = arith.constant 0 : index
    %c0_10 = arith.constant 0 : index
    %12 = vector.load %arg5[%c0_9, %c0_10] : memref<1x384xf32, #tpu.memory_space<vmem>>, vector<1x384xf32>
    %13 = vector.broadcast %12 : vector<1x384xf32> to vector<8x384xf32>
    %14 = arith.addf %11, %13 : vector<8x384xf32>
    %cst_11 = arith.constant 0.000000e+00 : f32
    %15 = vector.broadcast %cst_11 : f32 to vector<8x384xf32>
    %16 = arith.maximumf %14, %15 : vector<8x384xf32>
    %c0_12 = arith.constant 0 : index
    %c0_13 = arith.constant 0 : index
    %17 = vector.load %arg6[%c0_12, %c0_13] : memref<1x384xbf16, #tpu.memory_space<vmem>>, vector<1x384xbf16>
    %18 = arith.truncf %16 : vector<8x384xf32> to vector<8x384xbf16>
    %cst_14 = arith.constant dense<0.000000e+00> : vector<1x8xf32>
    %19 = tpu.matmul %17, %18, %cst_14 {dimension_numbers = #tpu.dot_dimension_numbers<[1], [1], [0], [0], [0, 0, 1, 0], [], []>} : vector<1x384xbf16>, vector<8x384xbf16>, vector<1x8xf32> -> vector<1x8xf32>
    %c0_15 = arith.constant 0 : index
    %c0_16 = arith.constant 0 : index
    %20 = vector.load %arg7[%c0_15, %c0_16] : memref<1x1xf32, #tpu.memory_space<vmem>>, vector<1x1xf32>
    %21 = vector.broadcast %20 : vector<1x1xf32> to vector<1x8xf32>
    %22 = arith.addf %19, %21 : vector<1x8xf32>
    %cst_17 = arith.constant 0.000000e+00 : f32
    %23 = vector.broadcast %cst_17 : f32 to vector<1x8xf32>
    %24 = arith.maximumf %22, %23 : vector<1x8xf32>
    %c0_18 = arith.constant 0 : index
    %c0_19 = arith.constant 0 : index
    %25 = vector.load %arg8[%c0_18, %c0_19] : memref<1x8xf32, #tpu.memory_space<vmem>>, vector<1x8xf32>
    tpu.vector_store %arg8[%c0_18, %c0_19], %24 {strides = array<i32>} : memref<1x8xf32, #tpu.memory_space<vmem>>, vector<1x8xf32>,
    return
  }
  func.func @transform_0(%arg0: i32) -> (i32, i32) {
    %c0_i32 = arith.constant 0 : i32
    %c0_i32_0 = arith.constant 0 : i32
    return %arg0, %c0_i32 : i32, i32
  }
  func.func @transform_1(%arg0: i32) -> (i32, i32) {
    %c0_i32 = arith.constant 0 : i32
    %c0_i32_0 = arith.constant 0 : i32
    %c0_i32_1 = arith.constant 0 : i32
    return %c0_i32, %c0_i32_0 : i32, i32
  }
  func.func @transform_2(%arg0: i32) -> (i32, i32) {
    %c0_i32 = arith.constant 0 : i32
    %c0_i32_0 = arith.constant 0 : i32
    %c0_i32_1 = arith.constant 0 : i32
    return %c0_i32, %c0_i32_0 : i32, i32
  }
  func.func @transform_3(%arg0: i32) -> (i32, i32) {
    %c0_i32 = arith.constant 0 : i32
    %c0_i32_0 = arith.constant 0 : i32
    %c0_i32_1 = arith.constant 0 : i32
    return %c0_i32, %c0_i32_0 : i32, i32
  }
  func.func @transform_4(%arg0: i32) -> (i32, i32) {
    %c0_i32 = arith.constant 0 : i32
    %c0_i32_0 = arith.constant 0 : i32
    %c0_i32_1 = arith.constant 0 : i32
    return %c0_i32, %c0_i32_0 : i32, i32
  }
  func.func @transform_5(%arg0: i32) -> (i32, i32) {
    %c0_i32 = arith.constant 0 : i32
    %c0_i32_0 = arith.constant 0 : i32
    %c0_i32_1 = arith.constant 0 : i32
    return %c0_i32, %c0_i32_0 : i32, i32
  }
  func.func @transform_6(%arg0: i32) -> (i32, i32) {
    %c0_i32 = arith.constant 0 : i32
    %c0_i32_0 = arith.constant 0 : i32
    %c0_i32_1 = arith.constant 0 : i32
    return %c0_i32, %c0_i32_0 : i32, i32
  }
  func.func @transform_7(%arg0: i32) -> (i32, i32) {
    %c0_i32 = arith.constant 0 : i32
    %c0_i32_0 = arith.constant 0 : i32
    return %arg0, %c0_i32 : i32, i32
  }
}

</mosaic_0001>

<bundles_post_ra>
// kernel: tpu_custom_call.1
= control target key start
LH: loop header
LB: loop body
LE: loop exit
PB: predicated region body
PF: predicated region fallthrough
CT: control target
= control target key end

     0   :  { %s2134_s0 = inlined_call_operand.hbm [shape: f32[8,16], index: 0, kind: input, shape index: {}]   ;;  %s2135_s1 = inlined_call_operand.hbm [shape: bf16[16,640], index: 1, kind: input, shape index: {}]   ;;  %s2136_s2 = inlined_call_operand.vmem [shape: f32[1,640], index: 2, kind: input, shape index: {}]   ;;  %s2137_s3 = inlined_call_operand.hbm [shape: bf16[640,384], index: 3, kind: input, shape index: {}]   ;;  %s2138_s4 = inlined_call_operand.vmem [shape: f32[1,384], index: 4, kind: input, shape index: {}]   ;;  %s2139_s5 = inlined_call_operand.vmem [shape: bf16[1,384], index: 5, kind: input, shape index: {}]   ;;  %s2140_s6 = inlined_call_operand.<no memory space> [shape: f32[1,1], index: 6, kind: input, shape index: {}]   ;;  %s2141_s7 = inlined_call_operand.hbm [shape: f32[1,8], index: 7, kind: output, shape index: {}]  }
   0x1   :  { %v12_v0 = vstv %s2140_s6 }
   0x2   :  { %13 = vst [vmem:[#allocation2] sm:$0x1] %v12_v0 }
   0x3   :  { %14 = vsyncpa [#allocation4], 0 }
   0x4   :  { %15 = vsyncpa [#allocation7], 0 }
   0x5   :  { %16 = vsyncpa [#allocation5], 0  ;;  %s1974_s26 = smov [#allocation6]   ;;  %s1880_s30 = scalar_lea.hbm %s2135_s1, 640 }
   0x6   :  { %s32_s27 = sshll.u32 %s1974_s26, 4  ;;  %p1881_p0 = scmp.ne.s32.totalorder %s2135_s1, %s1880_s30  ;;  %s33_s27 = int_to_ptr.vmem [resolvable:$true] %s32_s27 }
   0x7   :  { %p1884_p1 = scmp.lt.u32.totalorder %s1880_s30, %s2135_s1 }
   0x9   :  { %p1886_p2 = pnand %p1884_p1, %p1881_p0 }
   0xb   :  { %1889 = shalt.err (!%p1886_p2)
}
   0xc   :  { %s1890_s6 = scalar_lea.vmem %s33_s27, 640  ;;  %p1895_p4 = scmp.lt.s32.totalorder %s33_s27, %s33_s27 }
   0xd   :  { %p1891_p3 = scmp.ne.s32.totalorder %s33_s27, %s1890_s6  ;;  %p1896_p5 = scmp.lt.s32.totalorder %s1890_s6, %s1890_s6 }
   0xf   :  { %p1897_p6 = por %p1896_p5, %p1895_p4 }
  0x11   :  { %p1898_p7 = pnand %p1897_p6, %p1891_p3 }
  0x13   :  { %1901 = shalt.err (!%p1898_p7)
}
  0x14   :  { %s1975_s12 = smov 320   ;;  %s1976_s13 = smov 20  }
  0x15   :  { %38 = dma.hbm_to_vmem [thread:$0]  %s2135_s1, 640, %s33_s27, [#allocation7], %s1975_s12, %s1975_s12, %s1976_s13  }
  0x16   :  { %s1977_s16 = smov [#allocation3]   ;;  %s1978_s18 = smov [#allocation8]  }
  0x17   :  { %s23_s17 = sshll.u32 %s1977_s16, 4  ;;  %s46_s19 = sshll.u32 %s1978_s18, 4  ;;  %s24_s17 = int_to_ptr.vmem [resolvable:$true] %s23_s17  ;;  %s47_s19 = int_to_ptr.vmem [resolvable:$true] %s46_s19 }
  0x18   :  { %s1902_s22 = scalar_lea.hbm %s2134_s0, 128 }
  0x19   :  { %p1903_p8 = scmp.ne.s32.totalorder %s2134_s0, %s1902_s22  ;;  %p1906_p9 = scmp.lt.u32.totalorder %s1902_s22, %s2134_s0 }
  0x1b   :  { %p1908_p10 = pnand %p1906_p9, %p1903_p8 }
  0x1d   :  { %1911 = shalt.err (!%p1908_p10)
}
  0x1e   :  { %s1912_s1 = scalar_lea.vmem %s24_s17, 128  ;;  %p1917_p12 = scmp.lt.s32.totalorder %s24_s17, %s24_s17 }
  0x1f   :  { %p1913_p11 = scmp.ne.s32.totalorder %s24_s17, %s1912_s1  ;;  %p1918_p13 = scmp.lt.s32.totalorder %s1912_s1, %s1912_s1 }
  0x21   :  { %p1919_p0 = por %p1918_p13, %p1917_p12 }
  0x23   :  { %p1920_p1 = pnand %p1919_p0, %p1913_p11 }
  0x25   :  { %1923 = shalt.err (!%p1920_p1)
}
  0x26   :  { %26 = dma.hbm_to_vmem [thread:$0]  %s2134_s0, 128, %s24_s17, [#allocation4]  }
  0x27   :  { %s1924_s8 = scalar_lea.hbm %s2137_s3, 15360 }
  0x28   :  { %p1925_p2 = scmp.ne.s32.totalorder %s2137_s3, %s1924_s8  ;;  %p1928_p3 = scmp.lt.u32.totalorder %s1924_s8, %s2137_s3 }
  0x2a   :  { %p1930_p4 = pnand %p1928_p3, %p1925_p2 }
  0x2c   :  { %1933 = shalt.err (!%p1930_p4)
}
  0x2d   :  { %s1934_s12 = scalar_lea.vmem %s47_s19, 15360  ;;  %p1939_p6 = scmp.lt.s32.totalorder %s47_s19, %s47_s19 }
  0x2e   :  { %p1935_p5 = scmp.ne.s32.totalorder %s47_s19, %s1934_s12  ;;  %p1940_p7 = scmp.lt.s32.totalorder %s1934_s12, %s1934_s12 }
  0x30   :  { %p1941_p8 = por %p1940_p7, %p1939_p6 }
  0x32   :  { %p1942_p9 = pnand %p1941_p8, %p1935_p5 }
  0x34   :  { %1945 = shalt.err (!%p1942_p9)
}
  0x35   :  { %s1979_s0 = smov 192   ;;  %s1980_s13 = smov 12  }
  0x36   :  { %52 = dma.hbm_to_vmem [thread:$0]  %s2137_s3, 15360, %s47_s19, [#allocation7], %s1979_s0, %s1979_s0, %s1980_s13  }
  0x37   :  { %1968 = dma.done.wait [#allocation4], 128  }
  0x38   :  { %1969 = vsyncadd [#allocation4], 4294967168 }
  0x39   :  { %1970 = dma.done.wait [#allocation7], 16000  }
  0x3a   :  { %1971 = vsyncadd [#allocation7], 4294951296  ;;  %v1981_v1 = vmov 0.0   ;;  %vm1982_vm0 = vmmov 0   ;;  %v1983_v2 = vmov 0   ;;  %v69_v6 = vld [vmem:[#allocation3] sm:$0xff]  ;;  %v79_v60 = vlaneseq }
  0x3b   :  { %1655 = vmatprep.subr.bf16.mxu0 %v1981_v1  ;;  %1657 = vmatprep.mubr.msk.bf16.mxu0 %vm1982_vm0, %v1981_v1  ;;  %v1713_v3 = vld [vmem:[#allocation6 + $0x4] ss:$20 sps:$4 sm:$0xff]   ;;  %v1716_v5 = vld [vmem:[#allocation6] ss:$20 sps:$4 sm:$0xff]   ;;  %v70_v7 = vpack.c.bf16 %v69_v6, %v69_v6  ;;  %vm130_vm1 = vcmask 130048   ;;  %vm1451_vm2 = vcmask 57344  }
  0x3c   :  { %166 = vmatprep.mubr.bf16.mxu1 %v1983_v2  ;;  %1712 = vset.pattern.permute.xlu0 %v1983_v2  ;;  %v1715_v4 = vld [vmem:[#allocation6 + $0x10] ss:$20 sps:$4 sm:$0xff]   ;;  %v1719_v8 = vld [vmem:[#allocation6 + $0xc] ss:$20 sps:$4 sm:$0xff]   ;;  %v1717_v9 = vld [vmem:[#allocation6 + $0x8] ss:$20 sps:$4 sm:$0xff]  }
  0x3d   :  { %134 = vmatprep.subr.bf16.mxu1 %v1713_v3  ;;  %1656 = vmatpush3.bf16.msra.mxu0 %v1715_v4  ;;  %v1722_v10 = vld [vmem:[#allocation8 + $0x4] ss:$12 sps:$4 sm:$0xff]   ;;  %v1720_v11 = vld [vmem:[#allocation8] ss:$12 sps:$4 sm:$0xff]   ;;  %v1725_v12 = vld [vmem:[#allocation8 + $0x1c] ss:$12 sps:$4 sm:$0xff]  }
  0x3e   :  { %135 = vmatpush1.bf16.msra.mxu1 %v1716_v5  ;;  %v1744_v13 = vld [vmem:[#allocation8 + $0x300] ss:$12 sps:$4 sm:$0xff]   ;;  %v1746_v14 = vld [vmem:[#allocation8 + $0x304] ss:$12 sps:$4 sm:$0xff]   ;;  %v1752_v18 = vld [vmem:[#allocation8 + $0x31c] ss:$12 sps:$4 sm:$0xff]  }
  0x3f   :  { %175 = vmatprep.subr.bf16.mxu1 %v1719_v8  ;;  %v1723_v15 = vld [vmem:[#allocation8 + $0x18] ss:$12 sps:$4 sm:$0xff]   ;;  %v1728_v16 = vld [vmem:[#allocation8 + $0x34] ss:$12 sps:$4 sm:$0xff]   ;;  %1165 = vmatprep.subr.bf16.mxu0 %v1746_v14  ;;  %v1726_v19 = vld [vmem:[#allocation8 + $0x30] ss:$12 sps:$4 sm:$0xff]  }
  0x40   :  { %1658 = vmatmul.mubr.msk.bf16.vlgmr.msra.gmra.mrb[0].mxu0 %vm130_vm1, %v70_v7  ;;  %v1750_v17 = vld [vmem:[#allocation8 + $0x318] ss:$12 sps:$4 sm:$0xff]   ;;  %v1758_v21 = vld [vmem:[#allocation8 + $0x334] ss:$12 sps:$4 sm:$0xff]   ;;  %v1756_v22 = vld [vmem:[#allocation8 + $0x330] ss:$12 sps:$4 sm:$0xff]  }
  0x41   :  { %1474 = vmatmul.mubr.msk.bf16.vlgmr.msra.gmra.mrb[0].mxu1 %vm130_vm1, %v70_v7  ;;  %1197 = vmatprep.mubr.bf16.mxu0 %v1983_v2  ;;  %v1731_v20 = vld [vmem:[#allocation8 + $0x4c] ss:$12 sps:$4 sm:$0xff]   ;;  %v1729_v24 = vld [vmem:[#allocation8 + $0x48] ss:$12 sps:$4 sm:$0xff]   ;;  %v1734_v25 = vld [vmem:[#allocation8 + $0x64] ss:$12 sps:$4 sm:$0xff]  }
  0x42   :  { %176 = vmatpush1.bf16.msra.mxu1 %v1717_v9  ;;  %207 = vmatprep.mubr.bf16.mxu1 %v1983_v2  ;;  %v1764_v23 = vld [vmem:[#allocation8 + $0x34c] ss:$12 sps:$4 sm:$0xff]   ;;  %v1762_v26 = vld [vmem:[#allocation8 + $0x348] ss:$12 sps:$4 sm:$0xff]   ;;  %v1770_v27 = vld [vmem:[#allocation8 + $0x364] ss:$12 sps:$4 sm:$0xff]  }
  0x43   :  { %1083 = vmatprep.subr.bf16.mxu1 %v1722_v10  ;;  %1166 = vmatpush1.bf16.msra.mxu0 %v1744_v13  ;;  %v1732_v28 = vld [vmem:[#allocation8 + $0x60] ss:$12 sps:$4 sm:$0xff]   ;;  %v1737_v29 = vld [vmem:[#allocation8 + $0x7c] ss:$12 sps:$4 sm:$0xff]   ;;  %v1735_v30 = vld [vmem:[#allocation8 + $0x78] ss:$12 sps:$4 sm:$0xff]  }
  0x44   :  { %1167 = vmatprep.subr.bf16.mxu0 %v1752_v18  ;;  %v1768_v31 = vld [vmem:[#allocation8 + $0x360] ss:$12 sps:$4 sm:$0xff]   ;;  %v1776_v33 = vld [vmem:[#allocation8 + $0x37c] ss:$12 sps:$4 sm:$0xff]   ;;  %v1774_v34 = vld [vmem:[#allocation8 + $0x378] ss:$12 sps:$4 sm:$0xff]  }
  0x45   :  { %v1740_v32 = vld [vmem:[#allocation8 + $0x94] ss:$12 sps:$4 sm:$0xff]   ;;  %v1738_v36 = vld [vmem:[#allocation8 + $0x90] ss:$12 sps:$4 sm:$0xff]   ;;  %v1743_v37 = vld [vmem:[#allocation8 + $0xac] ss:$12 sps:$4 sm:$0xff]  }
  0x46   :  { %v1782_v35 = vld [vmem:[#allocation8 + $0x394] ss:$12 sps:$4 sm:$0xff]   ;;  %v1780_v38 = vld [vmem:[#allocation8 + $0x390] ss:$12 sps:$4 sm:$0xff]   ;;  %v1753_v43 = vld [vmem:[#allocation8 + $0xd8] ss:$12 sps:$4 sm:$0xff]  }
  0x47   :  { %1168 = vmatpush1.bf16.msra.mxu0 %v1750_v17  ;;  %v1741_v39 = vld [vmem:[#allocation8 + $0xa8] ss:$12 sps:$4 sm:$0xff]   ;;  %v1749_v40 = vld [vmem:[#allocation8 + $0xc4] ss:$12 sps:$4 sm:$0xff]   ;;  %v1747_v41 = vld [vmem:[#allocation8 + $0xc0] ss:$12 sps:$4 sm:$0xff]  }
  0x48   :  { %1169 = vmatprep.subr.bf16.mxu0 %v1758_v21  ;;  %v1755_v42 = vld [vmem:[#allocation8 + $0xdc] ss:$12 sps:$4 sm:$0xff]   ;;  %v1761_v44 = vld [vmem:[#allocation8 + $0xf4] ss:$12 sps:$4 sm:$0xff]   ;;  %v1767_v46 = vld [vmem:[#allocation8 + $0x10c] ss:$12 sps:$4 sm:$0xff]  }
  0x49   :  { %1475 = vmatmul.mubr.msk.bf16.vlgmr.msra.gmra.mrb[4].mxu1 %vm130_vm1, %v70_v7  ;;  %v1759_v45 = vld [vmem:[#allocation8 + $0xf0] ss:$12 sps:$4 sm:$0xff]   ;;  %v1765_v47 = vld [vmem:[#allocation8 + $0x108] ss:$12 sps:$4 sm:$0xff]   ;;  %v1771_v49 = vld [vmem:[#allocation8 + $0x120] ss:$12 sps:$4 sm:$0xff]  }
  0x4a   :  { %1084 = vmatpush1.bf16.msra.mxu1 %v1720_v11  ;;  %v1773_v48 = vld [vmem:[#allocation8 + $0x124] ss:$12 sps:$4 sm:$0xff]   ;;  %v1779_v50 = vld [vmem:[#allocation8 + $0x13c] ss:$12 sps:$4 sm:$0xff]   ;;  %v1785_v52 = vld [vmem:[#allocation8 + $0x154] ss:$12 sps:$4 sm:$0xff]  }
  0x4b   :  { %1085 = vmatprep.subr.bf16.mxu1 %v1725_v12  ;;  %1170 = vmatpush1.bf16.msra.mxu0 %v1756_v22  ;;  %v1777_v51 = vld [vmem:[#allocation8 + $0x138] ss:$12 sps:$4 sm:$0xff]   ;;  %v1783_v53 = vld [vmem:[#allocation8 + $0x150] ss:$12 sps:$4 sm:$0xff]   ;;  %v1786_v55 = vld [vmem:[#allocation8 + $0x3a8] ss:$12 sps:$4 sm:$0xff]  }
  0x4c   :  { %1171 = vmatprep.subr.bf16.mxu0 %v1764_v23  ;;  %v1788_v54 = vld [vmem:[#allocation8 + $0x3ac] ss:$12 sps:$4 sm:$0xff]   ;;  %v1789_v57 = vld [vmem:[#allocation8 + $0x168] ss:$12 sps:$4 sm:$0xff]   ;;  %v1796_v59 = vld [vmem:[#allocation8 + $0x184] ss:$12 sps:$4 sm:$0xff]  }
  0x4d   :  { %v1791_v56 = vld [vmem:[#allocation8 + $0x16c] ss:$12 sps:$4 sm:$0xff]   ;;  %v1792_v58 = vld [vmem:[#allocation8 + $0xc8] ss:$12 sps:$4 sm:$0xff]   ;;  %v2068_v61 = vshrl.u32 %v79_v60, 7 }
  0x4e   :  { %1086 = vmatpush1.bf16.msra.mxu1 %v1723_v15  ;;  %v77_v63 = vld [vmem:[%s2136_s2] sm:$0x1f] }
  0x4f   :  { %1087 = vmatprep.subr.bf16.mxu1 %v1728_v16  ;;  %1172 = vmatpush1.bf16.msra.mxu0 %v1762_v26  ;;  %v97_v62 = vsub.s32 4, %v2068_v61  ;;  %v2075_v0 = vsub.s32 0, %v2068_v61  ;;  %v85_v2 = vsub.s32 1, %v2068_v61  ;;  %v89_v13 = vsub.s32 2, %v2068_v61  ;;  %v1827_v60 = vld [vmem:[#allocation8 + $0x170] ss:$12 sps:$4 sm:$0xff]  }
  0x50   :  { %1173 = vmatprep.subr.bf16.mxu0 %v1770_v27  ;;  %v93_v18 = vsub.s32 3, %v2068_v61 }
  0x51   :  { %v98_v3 = vrot.slane %v77_v63, %v97_v62  ;;  %v82_v4 = vrot.slane %v77_v63, %v2075_v0  ;;  %v86_v5 = vrot.slane %v77_v63, %v85_v2  ;;  %v90_v26 = vrot.slane %v77_v63, %v89_v13  ;;  %v1824_v62 = vld [vmem:[#allocation8 + $0x210] ss:$12 sps:$4 sm:$0xff]  }
  0x52   :  { %1088 = vmatpush1.bf16.msra.mxu1 %v1726_v19 }
  0x53   :  { %1089 = vmatprep.subr.bf16.mxu1 %v1731_v20  ;;  %1174 = vmatpush1.bf16.msra.mxu0 %v1768_v31  ;;  %v1793_v20 = vld [vmem:[#allocation8 + $0x8] ss:$12 sps:$4 sm:$0xff]  }
  0x54   :  { %1175 = vmatprep.subr.bf16.mxu0 %v1776_v33  ;;  %v1801_v31 = vld [vmem:[#allocation8 + $0x19c] ss:$12 sps:$4 sm:$0xff]  }
  0x56   :  { %1090 = vmatpush1.bf16.msra.mxu1 %v1729_v24  ;;  %v1797_v24 = vld [vmem:[#allocation8 + $0xe0] ss:$12 sps:$4 sm:$0xff]  }
  0x57   :  { %1091 = vmatprep.subr.bf16.mxu1 %v1734_v25  ;;  %1176 = vmatpush1.bf16.msra.mxu0 %v1774_v34 }
  0x58   :  { %1177 = vmatprep.subr.bf16.mxu0 %v1782_v35 }
  0x5a   :  { %1092 = vmatpush1.bf16.msra.mxu1 %v1732_v28  ;;  %v1794_v28 = vld [vmem:[#allocation8 + $0x180] ss:$12 sps:$4 sm:$0xff]  }
  0x5b   :  { %1093 = vmatprep.subr.bf16.mxu1 %v1737_v29  ;;  %1178 = vmatpush1.bf16.msra.mxu0 %v1780_v38  ;;  %v94_v29 = vrot.slane %v77_v63, %v93_v18  ;;  %v1828_v63 = vld [vmem:[#allocation8 + $0xb0] ss:$12 sps:$4 sm:$0xff]  }
  0x5c   :  { %1179 = vmatprep.subr.bf16.mxu0 %v1788_v54  ;;  %v1818_v54 = vld [vmem:[#allocation8 + $0x80] ss:$12 sps:$4 sm:$0xff]   ;;  %v1844_v18 = vld [vmem:[#allocation8 + $0x270] ss:$12 sps:$4 sm:$0xff]  }
  0x5e   :  { %1094 = vmatpush1.bf16.msra.mxu1 %v1735_v30  ;;  %v1798_v30 = vld [vmem:[#allocation8 + $0x20] ss:$12 sps:$4 sm:$0xff]  }
  0x5f   :  { %1095 = vmatprep.subr.bf16.mxu1 %v1740_v32  ;;  %1180 = vmatpush1.bf16.msra.mxu0 %v1786_v55  ;;  %v1802_v32 = vld [vmem:[#allocation8 + $0xf8] ss:$12 sps:$4 sm:$0xff]   ;;  %v1821_v55 = vld [vmem:[#allocation8 + $0x1fc] ss:$12 sps:$4 sm:$0xff]  }
  0x60   :  { %1600 = vmatprep.subr.bf16.mxu0 %v1792_v58  ;;  %v1823_v58 = vld [vmem:[#allocation8 + $0x98] ss:$12 sps:$4 sm:$0xff]  }
  0x62   :  { %1096 = vmatpush1.bf16.msra.mxu1 %v1738_v36  ;;  %v1799_v36 = vld [vmem:[#allocation8 + $0x198] ss:$12 sps:$4 sm:$0xff]  }
  0x63   :  { %1097 = vmatprep.subr.bf16.mxu1 %v1743_v37 }
  0x66   :  { %1098 = vmatpush1.bf16.msra.mxu1 %v1741_v39  ;;  %v1803_v39 = vld [vmem:[#allocation8 + $0x38] ss:$12 sps:$4 sm:$0xff]  }
  0x67   :  { %1099 = vmatprep.subr.bf16.mxu1 %v1749_v40  ;;  %v1806_v40 = vld [vmem:[#allocation8 + $0x1b4] ss:$12 sps:$4 sm:$0xff]  }
  0x6a   :  { %1100 = vmatpush1.bf16.msra.mxu1 %v1747_v41 }
  0x6b   :  { %1101 = vmatprep.subr.bf16.mxu1 %v1755_v42  ;;  %v1807_v42 = vld [vmem:[#allocation8 + $0x110] ss:$12 sps:$4 sm:$0xff]  }
  0x6e   :  { %1102 = vmatpush1.bf16.msra.mxu1 %v1753_v43 }
  0x6f   :  { %1103 = vmatprep.subr.bf16.mxu1 %v1761_v44  ;;  %v1804_v44 = vld [vmem:[#allocation8 + $0x1b0] ss:$12 sps:$4 sm:$0xff]  }
  0x72   :  { %1104 = vmatpush1.bf16.msra.mxu1 %v1759_v45 }
  0x73   :  { %1105 = vmatprep.subr.bf16.mxu1 %v1767_v46  ;;  %v1808_v46 = vld [vmem:[#allocation8 + $0x50] ss:$12 sps:$4 sm:$0xff]  }
  0x76   :  { %1106 = vmatpush1.bf16.msra.mxu1 %v1765_v47  ;;  %v1811_v47 = vld [vmem:[#allocation8 + $0x1cc] ss:$12 sps:$4 sm:$0xff]  }
  0x77   :  { %1107 = vmatprep.subr.bf16.mxu1 %v1773_v48  ;;  %v1812_v48 = vld [vmem:[#allocation8 + $0x128] ss:$12 sps:$4 sm:$0xff]  }
  0x7a   :  { %1108 = vmatpush1.bf16.msra.mxu1 %v1771_v49  ;;  %v1809_v49 = vld [vmem:[#allocation8 + $0x1c8] ss:$12 sps:$4 sm:$0xff]  }
  0x7b   :  { %1109 = vmatprep.subr.bf16.mxu1 %v1779_v50  ;;  %v1813_v50 = vld [vmem:[#allocation8 + $0x68] ss:$12 sps:$4 sm:$0xff]  }
  0x7e   :  { %1110 = vmatpush1.bf16.msra.mxu1 %v1777_v51  ;;  %v1816_v51 = vld [vmem:[#allocation8 + $0x1e4] ss:$12 sps:$4 sm:$0xff]  }
  0x7f   :  { %1111 = vmatprep.subr.bf16.mxu1 %v1785_v52  ;;  %v1817_v52 = vld [vmem:[#allocation8 + $0x140] ss:$12 sps:$4 sm:$0xff]  }
  0x82   :  { %1112 = vmatpush1.bf16.msra.mxu1 %v1783_v53  ;;  %v1814_v53 = vld [vmem:[#allocation8 + $0x1e0] ss:$12 sps:$4 sm:$0xff]  }
  0x83   :  { %1113 = vmatprep.subr.bf16.mxu1 %v1791_v56  ;;  %v1822_v56 = vld [vmem:[#allocation8 + $0x158] ss:$12 sps:$4 sm:$0xff]  }
  0x86   :  { %1114 = vmatpush1.bf16.msra.mxu1 %v1789_v57  ;;  %v1819_v57 = vld [vmem:[#allocation8 + $0x1f8] ss:$12 sps:$4 sm:$0xff]  }
  0x87   :  { %1124 = vmatprep.subr.bf16.mxu1 %v1796_v59  ;;  %v1826_v59 = vld [vmem:[#allocation8 + $0x214] ss:$12 sps:$4 sm:$0xff]  }
 0x113   :  { %v250_v6 = vpop.f32.mrb[0].mxu0 }
 0x114   :  { %v251_v7 = vadd.f32 %v250_v6, %v98_v3  ;;  %v168_v8 = vpop.f32.mrb[0].mxu1  ;;  %v1659_v9 = vpop.f32.mrb[1].mxu0  ;;  %v1831_v3 = vld [vmem:[#allocation8 + $0x22c] ss:$12 sps:$4 sm:$0xff]   ;;  %v1833_v6 = vld [vmem:[#allocation8 + $0x188] ss:$12 sps:$4 sm:$0xff]  }
 0x115   :  { %v169_v10 = vadd.f32 %v168_v8, %v82_v4  ;;  %v170_v11 = vpop.f32.mrb[1].mxu1  ;;  %v253_v12 = vpop.f32.mrb[2].mxu0  ;;  %v1832_v4 = vld [vmem:[#allocation8 + $0x248] ss:$12 sps:$4 sm:$0xff]   ;;  %v1837_v8 = vld [vmem:[#allocation8 + $0x260] ss:$12 sps:$4 sm:$0xff]  }
 0x116   :  { %v260_v14 = vmax.f32 %v251_v7, 0.0  ;;  %v171_v15 = vadd.f32 %v170_v11, %v86_v5  ;;  %v1660_v16 = vpop.f32.mrb[3].mxu0  ;;  %v172_v17 = vpop.f32.mrb[2].mxu1  ;;  %v1829_v5 = vld [vmem:[#allocation8 + $0x228] ss:$12 sps:$4 sm:$0xff]  }
 0x117   :  { %v256_v19 = vmax.f32 %v169_v10, 0.0  ;;  %v173_v21 = vpop.f32.mrb[3].mxu1  ;;  %v1836_v7 = vld [vmem:[#allocation8 + $0x244] ss:$12 sps:$4 sm:$0xff]   ;;  %v1834_v9 = vld [vmem:[#allocation8 + $0x240] ss:$12 sps:$4 sm:$0xff]  }
 0x118   :  { %v2083_v22 = vpack.c.bf16 %v260_v14, %v260_v14  ;;  %v257_v23 = vmax.f32 %v171_v15, 0.0  ;;  %v1838_v10 = vld [vmem:[#allocation8 + $0x1a0] ss:$12 sps:$4 sm:$0xff]   ;;  %v1841_v11 = vld [vmem:[#allocation8 + $0x25c] ss:$12 sps:$4 sm:$0xff]  }
 0x119   :  { %v2085_v25 = vpack.c.bf16 %v256_v19, %v256_v19  ;;  %v1842_v12 = vld [vmem:[#allocation8 + $0x278] ss:$12 sps:$4 sm:$0xff]   ;;  %v1846_v16 = vld [vmem:[#allocation8 + $0x274] ss:$12 sps:$4 sm:$0xff]   ;;  %v1847_v17 = vld [vmem:[#allocation8 + $0x290] ss:$12 sps:$4 sm:$0xff]  }
 0x11a   :  { %v262_v27 = vpack.c.bf16 %v257_v23, %v257_v23  ;;  %1198 = vmatmul.mubr.bf16.vlgmr.msra.gmra.mrb[4].mxu0 %v2083_v22  ;;  %v1839_v14 = vld [vmem:[#allocation8 + $0x258] ss:$12 sps:$4 sm:$0xff]   ;;  %v1848_v19 = vld [vmem:[#allocation8 + $0x1d0] ss:$12 sps:$4 sm:$0xff]   ;;  %v1852_v21 = vld [vmem:[#allocation8 + $0x2a8] ss:$12 sps:$4 sm:$0xff]  }
 0x11b   :  { %1601 = vmatpush3.bf16.msra.mxu0 %v1793_v20  ;;  %v1843_v15 = vld [vmem:[#allocation8 + $0x1b8] ss:$12 sps:$4 sm:$0xff]   ;;  %v1849_v23 = vld [vmem:[#allocation8 + $0x288] ss:$12 sps:$4 sm:$0xff]  }
 0x11c   :  { %1115 = vmatprep.mubr.bf16.mxu1 %v262_v27  ;;  %1602 = vmatprep.subr.bf16.mxu0 %v1797_v24  ;;  %v209_v33 = vpop.f32.mrb[4].mxu1  ;;  %v1851_v20 = vld [vmem:[#allocation8 + $0x28c] ss:$12 sps:$4 sm:$0xff]   ;;  %v1853_v24 = vld [vmem:[#allocation8 + $0x1e8] ss:$12 sps:$4 sm:$0xff]  }
 0x11d   :  { %1116 = vmatmul.mubr.bf16.vlgmr.msra.gmra.mrb[8].mxu1 %v2085_v25  ;;  %1238 = vmatprep.mubr.bf16.mxu0 %v262_v27  ;;  %v2091_v34 = vadd.f32 %v209_v33, %v90_v26  ;;  %v211_v35 = vpop.f32.mrb[5].mxu1  ;;  %v1857_v26 = vld [vmem:[#allocation8 + $0x2c0] ss:$12 sps:$4 sm:$0xff]  }
 0x11e   :  { %1125 = vmatpush1.bf16.msra.mxu1 %v1794_v28  ;;  %v212_v37 = vadd.f32 %v211_v35, %v94_v29  ;;  %v213_v38 = vpop.f32.mrb[6].mxu1  ;;  %v1854_v27 = vld [vmem:[#allocation8 + $0x2a0] ss:$12 sps:$4 sm:$0xff]   ;;  %v1861_v29 = vld [vmem:[#allocation8 + $0x2bc] ss:$12 sps:$4 sm:$0xff]  }
 0x11f   :  { %1603 = vmatpush3.bf16.msra.mxu0 %v1798_v30  ;;  %1126 = vmatprep.subr.bf16.mxu1 %v1801_v31  ;;  %v214_v41 = vpop.f32.mrb[7].mxu1  ;;  %v1858_v28 = vld [vmem:[#allocation8 + $0x200] ss:$12 sps:$4 sm:$0xff]   ;;  %v1862_v30 = vld [vmem:[#allocation8 + $0x2d8] ss:$12 sps:$4 sm:$0xff]  }
 0x120   :  { %1604 = vmatprep.subr.bf16.mxu0 %v1802_v32  ;;  %v259_v43 = vmax.f32 %v212_v37, 0.0  ;;  %v1859_v31 = vld [vmem:[#allocation8 + $0x2b8] ss:$12 sps:$4 sm:$0xff]   ;;  %v1866_v33 = vld [vmem:[#allocation8 + $0x2d4] ss:$12 sps:$4 sm:$0xff]  }
 0x121   :  { %v1863_v32 = vld [vmem:[#allocation8 + $0x218] ss:$12 sps:$4 sm:$0xff]   ;;  %v1867_v35 = vld [vmem:[#allocation8 + $0x2f0] ss:$12 sps:$4 sm:$0xff]   ;;  %v1869_v41 = vld [vmem:[#allocation8 + $0x2e8] ss:$12 sps:$4 sm:$0xff]  }
 0x122   :  { %1127 = vmatpush1.bf16.msra.mxu1 %v1799_v36  ;;  %v264_v45 = vpack.c.bf16 %v259_v43, %v259_v43  ;;  %v258_v36 = vmax.f32 %v2091_v34, 0.0  ;;  %v1864_v37 = vld [vmem:[#allocation8 + $0x2d0] ss:$12 sps:$4 sm:$0xff]   ;;  %v1873_v43 = vld [vmem:[#allocation8 + $0x320] ss:$12 sps:$4 sm:$0xff]  }
 0x123   :  { %1605 = vmatpush3.bf16.msra.mxu0 %v1803_v39  ;;  %1128 = vmatprep.subr.bf16.mxu1 %v1806_v40  ;;  %v1868_v38 = vld [vmem:[#allocation8 + $0x230] ss:$12 sps:$4 sm:$0xff]   ;;  %v1871_v39 = vld [vmem:[#allocation8 + $0x2ec] ss:$12 sps:$4 sm:$0xff]  }
 0x124   :  { %1606 = vmatprep.subr.bf16.mxu0 %v1807_v42  ;;  %1156 = vmatprep.mubr.bf16.mxu1 %v264_v45  ;;  %v263_v40 = vpack.c.bf16 %v258_v36, %v258_v36  ;;  %v1872_v42 = vld [vmem:[#allocation8 + $0x308] ss:$12 sps:$4 sm:$0xff]   ;;  %v1874_v34 = vld [vmem:[#allocation8 + $0x338] ss:$12 sps:$4 sm:$0xff]  }
 0x126   :  { %1129 = vmatpush1.bf16.msra.mxu1 %v1804_v44  ;;  %v1875_v44 = vld [vmem:[#allocation8 + $0x350] ss:$12 sps:$4 sm:$0xff]  }
 0x127   :  { %1607 = vmatpush3.bf16.msra.mxu0 %v1808_v46  ;;  %1130 = vmatprep.subr.bf16.mxu1 %v1811_v47  ;;  %v1877_v46 = vld [vmem:[#allocation8 + $0x380] ss:$12 sps:$4 sm:$0xff]   ;;  %v1878_v47 = vld [vmem:[#allocation8 + $0x398] ss:$12 sps:$4 sm:$0xff]  }
 0x128   :  { %1608 = vmatprep.subr.bf16.mxu0 %v1812_v48  ;;  %v1879_v48 = vld [vmem:[#allocation8 + $0x3b0] ss:$12 sps:$4 sm:$0xff]  }
 0x12a   :  { %1131 = vmatpush1.bf16.msra.mxu1 %v1809_v49  ;;  %v1984_v49 = vmov 1966171168  }
 0x12b   :  { %1609 = vmatpush3.bf16.msra.mxu0 %v1813_v50  ;;  %1132 = vmatprep.subr.bf16.mxu1 %v1816_v51  ;;  %v1353_v50 = vunpack.c.l.s4 %v1984_v49 }
 0x12c   :  { %1610 = vmatprep.subr.bf16.mxu0 %v1817_v52  ;;  %v1597_v52 = vld.sshfl [vmem:[%s2139_s5] sm:$0x13 pattern:$0x75316420] }
 0x12d   :  { %v1354_v51 = vunpack.c.0.s8 %v1353_v50 }
 0x12e   :  { %1133 = vmatpush1.bf16.msra.mxu1 %v1814_v53  ;;  %v1351_v53 = vcombine.high %v1597_v52, %v1597_v52 }
 0x12f   :  { %1611 = vmatpush3.bf16.msra.mxu0 %v1818_v54  ;;  %1134 = vmatprep.subr.bf16.mxu1 %v1821_v55  ;;  %v1357_v54 = vsub.s32 %v1354_v51, %v2068_v61 }
 0x130   :  { %1612 = vmatprep.subr.bf16.mxu0 %v1822_v56 }
 0x131   :  { %v1365_v55 = vrot.slane %v1351_v53, %v1357_v54  ;;  %v1358_v56 = vrot.slane %v1597_v52, %v1357_v54 }
 0x132   :  { %1135 = vmatpush1.bf16.msra.mxu1 %v1819_v57  ;;  %v1333_v57 = vld [vmem:[#allocation2] sm:$0x1] }
 0x133   :  { %1613 = vmatpush3.bf16.msra.mxu0 %v1823_v58  ;;  %1136 = vmatprep.subr.bf16.mxu1 %v1826_v59  ;;  %v1366_v36 = vcombine.high %v1358_v56, %v1358_v56 }
 0x134   :  { %1614 = vmatprep.subr.bf16.mxu0 %v1827_v60  ;;  %1336 = vperm.xlu0 %1712, %v1333_v57  }
 0x136   :  { %1137 = vmatpush1.bf16.msra.mxu1 %v1824_v62 }
 0x137   :  { %1615 = vmatpush3.bf16.msra.mxu0 %v1828_v63  ;;  %1138 = vmatprep.subr.bf16.mxu1 %v1831_v3 }
 0x138   :  { %1622 = vmatprep.subr.bf16.mxu0 %v1832_v4 }
 0x13a   :  { %1139 = vmatpush1.bf16.msra.mxu1 %v1829_v5  ;;  %1239 = vmatmul.mubr.bf16.vlgmr.msra.gmra.mrb[8].mxu0 %v2085_v25  ;;  %v1856_v25 = vld [vmem:[#allocation8 + $0x2a4] ss:$12 sps:$4 sm:$0xff]  }
 0x13b   :  { %1623 = vmatpush3.bf16.msra.mxu0 %v1833_v6  ;;  %1140 = vmatprep.subr.bf16.mxu1 %v1836_v7  ;;  %v426_v6 = vld [vmem:[%s2138_s4] sm:$0x7]  ;;  %s1985_s4 = smov [#allocation9]  }
 0x13c   :  { %1624 = vmatprep.subr.bf16.mxu0 %v1837_v8  ;;  %1278 = vmatprep.mubr.bf16.mxu0 %v264_v45  ;;  %v1876_v45 = vld [vmem:[#allocation8 + $0x368] ss:$12 sps:$4 sm:$0xff]   ;;  %v439_v7 = vrot.slane %v426_v6, %v89_v13  ;;  %s1459_s5 = sshll.u32 %s1985_s4, 4  ;;  %s1460_s5 = int_to_ptr.vmem [resolvable:$true] %s1459_s5 }
 0x13d   :  { %s1946_s20 = scalar_lea.vmem %s1460_s5, 16  ;;  %s1950_s21 = scalar_lea.vmem %s1460_s5, 32 }
 0x13e   :  { %1141 = vmatpush1.bf16.msra.mxu1 %v1834_v9  ;;  %v431_v9 = vrot.slane %v426_v6, %v2075_v0  ;;  %p1947_p10 = scmp.ne.s32.totalorder %s1460_s5, %s1946_s20  ;;  %p1951_p11 = scmp.lt.s32.totalorder %s1460_s5, %s1460_s5 }
 0x13f   :  { %1625 = vmatpush3.bf16.msra.mxu0 %v1838_v10  ;;  %1142 = vmatprep.subr.bf16.mxu1 %v1841_v11  ;;  %v435_v11 = vrot.slane %v426_v6, %v85_v2  ;;  %p1952_p12 = scmp.lt.s32.totalorder %s1950_s21, %s1946_s20 }
 0x140   :  { %1626 = vmatprep.subr.bf16.mxu0 %v1842_v12 }
 0x141   :  { %p1953_p13 = por %p1952_p12, %p1951_p11 }
 0x142   :  { %1143 = vmatpush1.bf16.msra.mxu1 %v1839_v14 }
 0x143   :  { %1627 = vmatpush3.bf16.msra.mxu0 %v1843_v15  ;;  %1144 = vmatprep.subr.bf16.mxu1 %v1846_v16  ;;  %p1954_p0 = pnand %p1953_p13, %p1947_p10 }
 0x144   :  { %1628 = vmatprep.subr.bf16.mxu0 %v1847_v17 }
 0x146   :  { %1145 = vmatpush1.bf16.msra.mxu1 %v1844_v18 }
 0x147   :  { %1629 = vmatpush3.bf16.msra.mxu0 %v1848_v19  ;;  %1146 = vmatprep.subr.bf16.mxu1 %v1851_v20 }
 0x148   :  { %1630 = vmatprep.subr.bf16.mxu0 %v1852_v21 }
 0x14a   :  { %1147 = vmatpush1.bf16.msra.mxu1 %v1849_v23 }
 0x14b   :  { %1631 = vmatpush3.bf16.msra.mxu0 %v1853_v24  ;;  %1148 = vmatprep.subr.bf16.mxu1 %v1856_v25 }
 0x14c   :  { %1632 = vmatprep.subr.bf16.mxu0 %v1857_v26 }
 0x14e   :  { %1149 = vmatpush1.bf16.msra.mxu1 %v1854_v27 }
 0x14f   :  { %1633 = vmatpush3.bf16.msra.mxu0 %v1858_v28  ;;  %1150 = vmatprep.subr.bf16.mxu1 %v1861_v29 }
 0x150   :  { %1634 = vmatprep.subr.bf16.mxu0 %v1862_v30 }
 0x152   :  { %1151 = vmatpush1.bf16.msra.mxu1 %v1859_v31 }
 0x153   :  { %1635 = vmatpush3.bf16.msra.mxu0 %v1863_v32  ;;  %1152 = vmatprep.subr.bf16.mxu1 %v1866_v33 }
 0x154   :  { %1636 = vmatprep.subr.bf16.mxu0 %v1867_v35 }
 0x156   :  { %1153 = vmatpush1.bf16.msra.mxu1 %v1864_v37 }
 0x157   :  { %1637 = vmatpush3.bf16.msra.mxu0 %v1868_v38  ;;  %1154 = vmatprep.subr.bf16.mxu1 %v1871_v39 }
 0x158   :  { %1661 = vmatprep.subr.bf16.mxu0 %v1981_v1 }
 0x15a   :  { %1155 = vmatpush1.bf16.msra.mxu1 %v1869_v41  ;;  %1279 = vmatmul.mubr.bf16.vlgmr.msra.gmra.mrb[12].mxu0 %v263_v40 }
 0x15b   :  { %1662 = vmatpush3.bf16.msra.mxu0 %v1872_v42  ;;  %1677 = vmatprep.mubr.msk.bf16.mxu0 %vm1982_vm0, %v1981_v1 }
 0x15c   :  { %1663 = vmatprep.subr.bf16.mxu0 %v1981_v1 }
 0x15d   :  { %1157 = vmatmul.mubr.bf16.vlgmr.msra.gmra.mrb[8].mxu1 %v263_v40 }
 0x15f   :  { %1664 = vmatpush3.bf16.msra.mxu0 %v1873_v43 }
 0x160   :  { %1665 = vmatprep.subr.bf16.mxu0 %v1981_v1 }
 0x163   :  { %1666 = vmatpush3.bf16.msra.mxu0 %v1874_v34 }
 0x164   :  { %1667 = vmatprep.subr.bf16.mxu0 %v1981_v1 }
 0x167   :  { %1668 = vmatpush3.bf16.msra.mxu0 %v1875_v44 }
 0x168   :  { %1669 = vmatprep.subr.bf16.mxu0 %v1981_v1 }
 0x16b   :  { %1670 = vmatpush3.bf16.msra.mxu0 %v1876_v45 }
 0x16c   :  { %1671 = vmatprep.subr.bf16.mxu0 %v1981_v1 }
 0x16f   :  { %1672 = vmatpush3.bf16.msra.mxu0 %v1877_v46 }
 0x170   :  { %1673 = vmatprep.subr.bf16.mxu0 %v1981_v1 }
 0x173   :  { %1674 = vmatpush3.bf16.msra.mxu0 %v1878_v47 }
 0x174   :  { %1675 = vmatprep.subr.bf16.mxu0 %v1981_v1 }
 0x177   :  { %1676 = vmatpush3.bf16.msra.mxu0 %v1879_v48 }
 0x17a   :  { %1678 = vmatmul.mubr.bf16.vlgmr.msra.gmra.mrb[16].mxu0 %v2083_v22 }
 0x17b   :  { %1402 = vmatprep.mubr.bf16.mxu0 %v1365_v55 }
 0x1b3   :  { %v1337_v37 = vpop.permute.xlu0 %1336 }
 0x1b4   :  { %v1342_v38 = vrot.slane %v1337_v37, %v2075_v0 }
 0x1ed   :  { %v1199_v58 = vpop.f32.mrb[4].mxu0 }
 0x1ee   :  { %v1201_v59 = vpop.f32.mrb[5].mxu0 }
 0x1ef   :  { %v1203_v60 = vpop.f32.mrb[6].mxu0 }
 0x1f0   :  { %v1204_v62 = vpop.f32.mrb[7].mxu0 }
 0x20d   :  { %v1616_v22 = vpop.f32.mrb[8].mxu0 }
 0x20e   :  { %v1617_v63 = vpop.f32.mrb[9].mxu0 }
 0x20f   :  { %v1618_v3 = vadd.f32 %v1617_v63, %v1616_v22  ;;  %v1619_v4 = vpop.f32.mrb[10].mxu0 }
 0x210   :  { %v1620_v5 = vpop.f32.mrb[11].mxu0 }
 0x211   :  { %v1241_v12 = vadd.f32 %v1618_v3, %v439_v7 }
 0x22d   :  { %v1638_v8 = vpop.f32.mrb[12].mxu0 }
 0x22e   :  { %v1639_v10 = vpop.f32.mrb[13].mxu0 }
 0x22f   :  { %v1640_v14 = vadd.f32 %v1639_v10, %v1638_v8  ;;  %v1641_v15 = vpop.f32.mrb[14].mxu0 }
 0x230   :  { %v1158_v16 = vpop.f32.mrb[8].mxu1  ;;  %v1642_v17 = vpop.f32.mrb[15].mxu0 }
 0x231   :  { %v1687_v18 = vadd.f32 %v1158_v16, %v431_v9  ;;  %v1160_v19 = vpop.f32.mrb[9].mxu1  ;;  %v1281_v20 = vadd.f32 %v1640_v14, %v1241_v12 }
 0x232   :  { %v1689_v21 = vadd.f32 %v1160_v19, %v435_v11  ;;  %v1162_v23 = vpop.f32.mrb[10].mxu1 }
 0x233   :  { %v1688_v24 = vadd.f32 %v1687_v18, %v1199_v58  ;;  %v1163_v25 = vpop.f32.mrb[11].mxu1 }
 0x234   :  { %v1690_v13 = vadd.f32 %v1689_v21, %v1201_v59 }
 0x235   :  { %v1326_v26 = vmax.f32 %v1688_v24, 0.0 }
 0x236   :  { %v1327_v27 = vmax.f32 %v1690_v13, 0.0 }
 0x237   :  { %v1330_v29 = vpack.c.bf16 %v1326_v26, %v1326_v26 }
 0x238   :  { %v1331_v28 = vpack.c.bf16 %v1327_v27, %v1327_v27 }
 0x23a   :  { %1370 = vmatprep.subr.bf16.mxu0 %v1331_v28 }
 0x23b   :  { %1371 = vmatpush1.bf16.xpose.msra.mxu0 %v1330_v29 }
 0x23c   :  { %1681 = vmatprep.subr.bf16.mxu0 %v1981_v1 }
 0x242   :  { %1403 = vmatmul.mubr.bf16.vlgmr.msra.gmra.mrb[20].mxu0 %v1358_v56 }
 0x243   :  { %1683 = vmatprep.mubr.msk.bf16.mxu0 %vm1982_vm0, %v1981_v1 }
 0x24d   :  { %v1320_v61 = vpop.f32.mrb[16].mxu0 }
 0x24e   :  { %v1321_v2 = vadd.f32 %v1320_v61, %v1281_v20  ;;  %v1679_v30 = vpop.f32.mrb[17].mxu0 }
 0x24f   :  { %v1323_v31 = vpop.f32.mrb[18].mxu0 }
 0x250   :  { %v1328_v32 = vmax.f32 %v1321_v2, 0.0  ;;  %v1680_v33 = vpop.f32.mrb[19].mxu0 }
 0x252   :  { %v1332_v35 = vpack.c.bf16 %v1328_v32, %v1328_v32 }
 0x254   :  { %1682 = vmatpush3.bf16.xpose.msra.mxu0 %v1332_v35 }
 0x25b   :  { %1684 = vmatmul.mubr.bf16.vlgmr.msra.gmra.mrb[20].mxu0 %v1366_v36 }
 0x32e   :  { %v1444_v39 = vpop.f32.mrb[20].mxu0 }
 0x32f   :  { %v1691_v40 = vadd.f32 %v1444_v39, %v1342_v38  ;;  %v1685_v41 = vpop.f32.mrb[21].mxu0 }
 0x330   :  { %v1447_v42 = vpop.f32.mrb[22].mxu0 }
 0x331   :  { %v1450_v1 = vmax.f32 %v1691_v40, 0.0  ;;  %v1686_v43 = vpop.f32.mrb[23].mxu0 }
 0x333   :  { %1452 = vst.msk [vmem:[#allocation9] sm:$0x1] %vm1451_vm2, %v1450_v1 }
 0x334   :  { %1957 = shalt.err (!%p1954_p0)
}
 0x335   :  { %s1958_s24 = scalar_lea.hbm %s2141_s7, 16 }
 0x336   :  { %p1959_p1 = scmp.ne.s32.totalorder %s2141_s7, %s1958_s24  ;;  %p1962_p2 = scmp.lt.u32.totalorder %s1958_s24, %s2141_s7 }
 0x338   :  { %p1964_p3 = pnand %p1962_p2, %p1959_p1 }
 0x33a   :  { %1967 = shalt.err (!%p1964_p3)
}
 0x33b   :  { %1462 = dma.vmem_to_hbm [thread:$0]  %s1460_s5, 16, %s2141_s7, [#allocation5]  }
 0x33c   :  { %1972 = dma.done.wait [#allocation5], 16  }
 0x33d   :  { %1973 = vsyncadd [#allocation5], 4294967280 }
 0x33e   :  { %1466 = vsyncpa [#allocation4], 1 }
 0x33f   :  { %1467 = vsyncpa [#allocation7], 1 }
 0x340   :  { %1468 = vsyncpa [#allocation5], 1 }

</bundles_post_ra>
